<compile_context>
chip_gen: v5e
topology: v5e:2x2
jax: 0.10.0
libtpu: 0.0.40
codegen_flags: <defaults>
</compile_context>

<pallas_src>
import jax
import jax.numpy as jnp
import numpy as np
from jax import lax
from jax.experimental import pallas as pl
from jax.experimental.pallas import tpu as pltpu

EPS = 1e-5
_VMEM_LIMIT = 32 * 1024 * 1024     # safe scoped limit on v5e/v6e/v7x (v7x physical = 64 MiB)
_TILE_BUDGET = 8 * 1024 * 1024     # per-call activation-stream VMEM budget (double-buffered)


def _round_up(x, m):
    return -(-x // m) * m


def _choose_tm(M, row_bytes, budget=_TILE_BUDGET, cap=2048):
    """Largest power-of-two row tile whose double-buffered streams fit the VMEM budget,
    shrunk so the grid has >=2 steps when M allows (megacore sharding)."""
    tm = cap
    while tm > 128 and tm * row_bytes * 2 > budget:
        tm //= 2
    while tm > 128 and tm >= M:
        tm //= 2
    if M <= tm:
        tm = max(8, _round_up(M, 8))
    return tm


# --------------------------------------------------------------------------------------
# Kernel bodies
# --------------------------------------------------------------------------------------
def _make_preact_matmul_kernel(has_res, want_stats, valid_rows, tm):
    """relu(x*scale + shift) @ w (+ res); optional per-tile channel sum / sum-of-squares."""

    def kernel(*refs):
        n_in = 5 if has_res else 4
        x_ref, scale_ref, shift_ref, w_ref = refs[:4]
        res_ref = refs[4] if has_res else None
        o_ref = refs[n_in]

        # BN affine + ReLU in f32 (VPU), then bf16 operands into the MXU, f32 accumulate.
        a = jnp.maximum(x_ref[...] * scale_ref[...] + shift_ref[...], 0.0)
        if valid_rows is not None:  # zero padded tail rows so fused stats stay exact
            row = pl.program_id(0) * tm + lax.broadcasted_iota(jnp.int32, a.shape, 0)
            a = jnp.where(row < valid_rows, a, 0.0)
        o = jnp.dot(a.astype(w_ref.dtype), w_ref[...],
                    preferred_element_type=jnp.float32)
        if has_res:
            o = o + res_ref[...]
        o_ref[...] = o

        if want_stats:
            s_ref, ss_ref = refs[n_in + 1], refs[n_in + 2]
            cout = o.shape[-1]
            s_ref[...] = jnp.sum(o, axis=0, keepdims=True).reshape(1, 1, cout)
            ss_ref[...] = jnp.sum(o * o, axis=0, keepdims=True).reshape(1, 1, cout)

    return kernel


def _make_conv3x3_kernel(H, W, Ho, Wo, stride, Cp, Cout):
    """bn2 affine + ReLU + 3x3/stride/pad=1 conv for one NHWC image, plus bn3 stat partials."""

    def kernel(x_ref, scale_ref, shift_ref, w_ref, o_ref, s_ref, ss_ref,
               pad_ref, acc_ref):
        # x_ref: (1, H, W, Cp) tile of out1
        a = jnp.maximum(x_ref[0] * scale_ref[...] + shift_ref[...], 0.0)   # (H, W, Cp) f32

        # zero-padded halo in VMEM; padding applied AFTER bn+relu so the halo stays 0
        pad_ref[...] = jnp.zeros(pad_ref.shape, pad_ref.dtype)
        pad_ref[pl.ds(1, H), pl.ds(1, W), :] = a

        # 3x3 conv == 9 shifted (strided) patches, each a (Ho*Wo, Cp) x (Cp, Cout) matmul
        acc_ref[...] = jnp.zeros(acc_ref.shape, acc_ref.dtype)
        for ki in range(3):
            for kj in range(3):
                hs = pl.ds(ki, Ho) if stride == 1 else pl.ds(ki, Ho, stride)
                ws = pl.ds(kj, Wo) if stride == 1 else pl.ds(kj, Wo, stride)
                patch = pad_ref[hs, ws, :].reshape(Ho * Wo, Cp)
                acc_ref[...] += jnp.dot(patch.astype(w_ref.dtype),
                                        w_ref[ki * 3 + kj],
                                        preferred_element_type=jnp.float32)
        o = acc_ref[...]
        o_ref[...] = o
        # fused bn3 batch-statistics partials for this image
        s_ref[...] = jnp.sum(o, axis=0, keepdims=True).reshape(1, 1, Cout)
        ss_ref[...] = jnp.sum(o * o, axis=0, keepdims=True).reshape(1, 1, Cout)

    return kernel


# --------------------------------------------------------------------------------------
# pallas_call wrappers
# --------------------------------------------------------------------------------------
def preact_matmul(x, scale, shift, w, res=None, want_stats=False):
    """relu(x*scale + shift) @ w (+ res).  x:(M,Cin) f32, w:(Cin,Cout) bf16, res:(M,Cout) f32.
    Returns o[:M] (and per-channel sum / sum-of-squares of o when want_stats=True)."""
    M, Cin = x.shape
    Cout = w.shape[1]
    has_res = res is not None

    row_bytes = 4 * (Cin + Cout) + (4 * Cout if has_res else 0)
    tm = _choose_tm(M, row_bytes)
    M_pad = _round_up(M, tm)
    pad = M_pad - M
    if pad:
        x = jnp.pad(x, ((0, pad), (0, 0)))
        if has_res:
            res = jnp.pad(res, ((0, pad), (0, 0)))
    grid = (M_pad // tm,)

    in_specs = [
        pl.BlockSpec((tm, Cin), lambda i: (i, 0)),
        pl.BlockSpec((1, Cin), lambda i: (0, 0)),
        pl.BlockSpec((1, Cin), lambda i: (0, 0)),
        pl.BlockSpec((Cin, Cout), lambda i: (0, 0)),
    ]
    args = [x, scale.reshape(1, Cin), shift.reshape(1, Cin), w]
    if has_res:
        in_specs.append(pl.BlockSpec((tm, Cout), lambda i: (i, 0)))
        args.append(res)

    out_shapes = [jax.ShapeDtypeStruct((M_pad, Cout), jnp.float32)]
    out_specs = [pl.BlockSpec((tm, Cout), lambda i: (i, 0))]
    if want_stats:
        out_shapes += [jax.ShapeDtypeStruct((grid[0], 1, Cout), jnp.float32)] * 2
        out_specs += [pl.BlockSpec((1, 1, Cout), lambda i: (i, 0, 0))] * 2

    kernel = _make_preact_matmul_kernel(has_res, want_stats, M if pad else None, tm)
    outs = pl.pallas_call(
        kernel,
        out_shape=tuple(out_shapes) if len(out_shapes) > 1 else out_shapes[0],
        grid=grid,
        in_specs=in_specs,
        out_specs=tuple(out_specs) if len(out_specs) > 1 else out_specs[0],
        compiler_params=pltpu.CompilerParams(
            dimension_semantics=("parallel",), vmem_limit_bytes=_VMEM_LIMIT),
    )(*args)

    if want_stats:
        o, s, ss = outs
        return o[:M], s.sum(axis=0)[0], ss.sum(axis=0)[0]
    return outs[:M]


def bn_relu_conv3x3(out1_nhwc, scale, shift, w9, stride):
    """relu(out1*scale + shift) then 3x3/stride/pad=1 conv, one image per grid step.
    out1_nhwc:(N,H,W,Cp) f32; w9:(9,Cp,Cout) bf16.
    Returns (out2 flattened (N*Ho*Wo, Cout), channel sum, channel sum-of-squares)."""
    N, H, W, Cp = out1_nhwc.shape
    Cout = w9.shape[2]
    Ho = (H - 1) // stride + 1
    Wo = (W - 1) // stride + 1

    kernel = _make_conv3x3_kernel(H, W, Ho, Wo, stride, Cp, Cout)
    o, s, ss = pl.pallas_call(
        kernel,
        out_shape=(jax.ShapeDtypeStruct((N * Ho * Wo, Cout), jnp.float32),
                   jax.ShapeDtypeStruct((N, 1, Cout), jnp.float32),
                   jax.ShapeDtypeStruct((N, 1, Cout), jnp.float32)),
        grid=(N,),
        in_specs=[pl.BlockSpec((1, H, W, Cp), lambda n: (n, 0, 0, 0)),
                  pl.BlockSpec((1, Cp), lambda n: (0, 0)),
                  pl.BlockSpec((1, Cp), lambda n: (0, 0)),
                  pl.BlockSpec((9, Cp, Cout), lambda n: (0, 0, 0))],
        out_specs=(pl.BlockSpec((Ho * Wo, Cout), lambda n: (n, 0)),
                   pl.BlockSpec((1, 1, Cout), lambda n: (n, 0, 0)),
                   pl.BlockSpec((1, 1, Cout), lambda n: (n, 0, 0))),
        scratch_shapes=[pltpu.VMEM((H + 2, W + 2, Cp), jnp.float32),
                        pltpu.VMEM((Ho * Wo, Cout), jnp.float32)],
        compiler_params=pltpu.CompilerParams(
            dimension_semantics=("parallel",), vmem_limit_bytes=_VMEM_LIMIT),
    )(out1_nhwc, scale.reshape(1, Cp), shift.reshape(1, Cp), w9)
    return o, s.sum(axis=0)[0], ss.sum(axis=0)[0]


# --------------------------------------------------------------------------------------
# PreActBottleneck forward (Pallas)
# --------------------------------------------------------------------------------------
def _bn_scale_shift(gamma, beta, s, ss, count):
    mean = s / count
    var = jnp.maximum(ss / count - mean * mean, 0.0)   # biased var (training-mode BN)
    scale = gamma / jnp.sqrt(var + EPS)
    shift = beta - mean * scale
    return scale, shift


def preact_bottleneck_forward(x_nchw, params, stride):
    x = jnp.transpose(x_nchw, (0, 2, 3, 1)).astype(jnp.float32)   # -> NHWC
    N, H, W, Cin = x.shape
    planes = params["w1"].shape[1]
    Cout = params["w3"].shape[1]
    has_shortcut = (stride != 1) or (Cin != Cout)
    Ho = (H - 1) // stride + 1
    Wo = (W - 1) // stride + 1
    M1 = N * H * W
    M2 = N * Ho * Wo

    xf = x.reshape(M1, Cin)

    # bn1 statistics over the raw input (single fused sum/sumsq pass in JAX)
    s0 = jnp.sum(xf, axis=0)
    ss0 = jnp.sum(xf * xf, axis=0)
    s1, b1 = _bn_scale_shift(params["g1"], params["be1"], s0, ss0, M1)

    # conv1 (1x1): fused relu(bn1(x)) @ W1, also emits bn2 statistic partials
    out1, sum1, sumsq1 = preact_matmul(xf, s1, b1, params["w1"], want_stats=True)
    s2, b2 = _bn_scale_shift(params["g2"], params["be2"], sum1, sumsq1, M1)

    # shortcut: stride-s 1x1 conv on relu(bn1(x)) == spatial subsample + 1x1 matmul
    if has_shortcut:
        xs = x[:, ::stride, ::stride, :].reshape(M2, Cin)
        shortcut = preact_matmul(xs, s1, b1, params["wsc"])
    else:
        shortcut = xf                                   # identity (Cin == Cout, stride == 1)

    # conv2 (3x3, stride, pad 1): bn2+relu fused with the conv, emits bn3 partials
    out2, sum2, sumsq2 = bn_relu_conv3x3(out1.reshape(N, H, W, planes),
                                         s2, b2, params["w2"], stride)
    s3, b3 = _bn_scale_shift(params["g3"], params["be3"], sum2, sumsq2, M2)

    # conv3 (1x1) + residual: fused relu(bn3(out2)) @ W3 + shortcut
    out3 = preact_matmul(out2, s3, b3, params["w3"], res=shortcut)

    return jnp.transpose(out3.reshape(N, Ho, Wo, Cout), (0, 3, 1, 2))   # -> NCHW


# --------------------------------------------------------------------------------------
# Pure-JAX reference (lax.conv) for validation
# --------------------------------------------------------------------------------------
def reference_forward(x_nchw, params, stride, matmul_dtype=jnp.float32):
    x = jnp.transpose(x_nchw, (0, 2, 3, 1)).astype(jnp.float32)
    Cin = x.shape[-1]
    Cout = params["w3_oihw"].shape[0]
    has_shortcut = (stride != 1) or (Cin != Cout)

    def bn_relu_ref(a, g, b):
        m = a.mean(axis=(0, 1, 2))
        v = ((a - m) ** 2).mean(axis=(0, 1, 2))      # biased var (training-mode BN)
        return jnp.maximum((a - m) / jnp.sqrt(v + EPS) * g + b, 0.0)

    def conv(a, w_oihw, s, pad):
        w_hwio = jnp.transpose(w_oihw, (2, 3, 1, 0)).astype(matmul_dtype)
        return lax.conv_general_dilated(
            a.astype(matmul_dtype), w_hwio, (s, s), [(pad, pad), (pad, pad)],
            dimension_numbers=("NHWC", "HWIO", "NHWC"),
            preferred_element_type=jnp.float32)

    a1 = bn_relu_ref(x, params["g1"], params["be1"])
    sc = conv(a1, params["wsc_oihw"], stride, 0) if has_shortcut else x
    o = conv(a1, params["w1_oihw"], 1, 0)
    o = conv(bn_relu_ref(o, params["g2"], params["be2"]), params["w2_oihw"], stride, 1)
    o = conv(bn_relu_ref(o, params["g3"], params["be3"]), params["w3_oihw"], 1, 0)
    o = o + sc
    return jnp.transpose(o, (0, 3, 1, 2))


# --------------------------------------------------------------------------------------
if __name__ == "__main__":
    key = jax.random.PRNGKey(0)
    N, in_planes, H, W = 2, 4, 16, 16
    planes, stride, expansion = 4, 2, 4
    out_planes = expansion * planes

    ks = jax.random.split(key, 11)
    x = jax.random.normal(ks[0], (N, in_planes, H, W), jnp.float32)

    # deterministic synthetic parameters (shapes from the module's __init__)
    w1_oihw = 0.2 * jax.random.normal(ks[1], (planes, in_planes, 1, 1), jnp.float32)
    w2_oihw = 0.2 * jax.random.normal(ks[2], (planes, planes, 3, 3), jnp.float32)
    w3_oihw = 0.2 * jax.random.normal(ks[3], (out_planes, planes, 1, 1), jnp.float32)
    wsc_oihw = 0.2 * jax.random.normal(ks[4], (out_planes, in_planes, 1, 1), jnp.float32)
    g1 = 1.0 + 0.1 * jax.random.normal(ks[5], (in_planes,), jnp.float32)
    be1 = 0.1 * jax.random.normal(ks[6], (in_planes,), jnp.float32)
    g2 = 1.0 + 0.1 * jax.random.normal(ks[7], (planes,), jnp.float32)
    be2 = 0.1 * jax.random.normal(ks[8], (planes,), jnp.float32)
    g3 = 1.0 + 0.1 * jax.random.normal(ks[9], (planes,), jnp.float32)
    be3 = 0.1 * jax.random.normal(ks[10], (planes,), jnp.float32)

    params = {
        # matmul-form bf16 weights (MXU operands) for the Pallas kernels
        "w1": w1_oihw[:, :, 0, 0].T.astype(jnp.bfloat16),                              # (Cin, planes)
        "w2": jnp.transpose(w2_oihw, (2, 3, 1, 0)).reshape(9, planes, planes).astype(jnp.bfloat16),
        "w3": w3_oihw[:, :, 0, 0].T.astype(jnp.bfloat16),                              # (planes, 4*planes)
        "wsc": wsc_oihw[:, :, 0, 0].T.astype(jnp.bfloat16),                            # (Cin, 4*planes)
        # original OIHW f32 weights for the lax.conv reference
        "w1_oihw": w1_oihw, "w2_oihw": w2_oihw, "w3_oihw": w3_oihw, "wsc_oihw": wsc_oihw,
        "g1": g1, "be1": be1, "g2": g2, "be2": be2, "g3": g3, "be3": be3,
    }

    out = preact_bottleneck_forward(x, params, stride)
    jax.block_until_ready(out)
    assert out.shape == (N, out_planes, H // stride, W // stride)

    # Primary check: lax.conv reference using the same bf16 matmul operands (f32 accumulate).
    ref_bf16 = reference_forward(x, params, stride, matmul_dtype=jnp.bfloat16)
    np.testing.assert_allclose(np.asarray(out), np.asarray(ref_bf16), rtol=2e-2, atol=2e-2)

    # Secondary sanity check against exact-f32 module semantics (differences are purely the
    # bf16 quantization of the matmul operands), with a correspondingly loose tolerance.
    ref_f32 = reference_forward(x, params, stride, matmul_dtype=jnp.float32)
    np.testing.assert_allclose(np.asarray(out), np.asarray(ref_f32), rtol=2e-1, atol=1e-1)

    print("KERNEL_OK")
</pallas_src>

<mosaic_0001>
module attributes {stable_mosaic.version = 11 : i64} {
  func.func @kernel(%arg0: i32, %arg1: memref<256x4xf32, #tpu.memory_space<vmem>>, %arg2: memref<1x4xf32, #tpu.memory_space<vmem>>, %arg3: memref<1x4xf32, #tpu.memory_space<vmem>>, %arg4: memref<4x4xbf16, #tpu.memory_space<vmem>>, %arg5: memref<256x4xf32, #tpu.memory_space<vmem>>, %arg6: memref<1x1x4xf32, #tpu.memory_space<vmem>>, %arg7: memref<1x1x4xf32, #tpu.memory_space<vmem>>) attributes {dimension_semantics = [#tpu.dimension_semantics<parallel>], iteration_bounds = array<i64: 2>, scalar_prefetch = 0 : i64, scratch_operands = 0 : i64, tpu.core_type = #tpu.core_type<tc>, window_params = [{transform_indices = @transform_0, window_bounds = array<i64: 256, 4>}, {pipeline_mode = #tpu.pipeline_mode<synchronous>, transform_indices = @transform_1, window_bounds = array<i64: 1, 4>}, {pipeline_mode = #tpu.pipeline_mode<synchronous>, transform_indices = @transform_2, window_bounds = array<i64: 1, 4>}, {pipeline_mode = #tpu.pipeline_mode<synchronous>, transform_indices = @transform_3, window_bounds = array<i64: 4, 4>}, {transform_indices = @transform_4, window_bounds = array<i64: 256, 4>}, {transform_indices = @transform_5, window_bounds = array<i64: 1, 1, 4>}, {transform_indices = @transform_6, window_bounds = array<i64: 1, 1, 4>}]} {
    %c0 = arith.constant 0 : index
    %c0_0 = arith.constant 0 : index
    %0 = vector.load %arg1[%c0, %c0_0] : memref<256x4xf32, #tpu.memory_space<vmem>>, vector<256x4xf32>
    %c0_1 = arith.constant 0 : index
    %c0_2 = arith.constant 0 : index
    %1 = vector.load %arg2[%c0_1, %c0_2] : memref<1x4xf32, #tpu.memory_space<vmem>>, vector<1x4xf32>
    %2 = vector.broadcast %1 : vector<1x4xf32> to vector<256x4xf32>
    %3 = arith.mulf %0, %2 : vector<256x4xf32>
    %c0_3 = arith.constant 0 : index
    %c0_4 = arith.constant 0 : index
    %4 = vector.load %arg3[%c0_3, %c0_4] : memref<1x4xf32, #tpu.memory_space<vmem>>, vector<1x4xf32>
    %5 = vector.broadcast %4 : vector<1x4xf32> to vector<256x4xf32>
    %6 = arith.addf %3, %5 : vector<256x4xf32>
    %cst = arith.constant 0.000000e+00 : f32
    %7 = vector.broadcast %cst : f32 to vector<256x4xf32>
    %8 = arith.maximumf %6, %7 : vector<256x4xf32>
    %9 = arith.truncf %8 : vector<256x4xf32> to vector<256x4xbf16>
    %c0_5 = arith.constant 0 : index
    %c0_6 = arith.constant 0 : index
    %10 = vector.load %arg4[%c0_5, %c0_6] : memref<4x4xbf16, #tpu.memory_space<vmem>>, vector<4x4xbf16>
    %cst_7 = arith.constant dense<0.000000e+00> : vector<256x4xf32>
    %11 = tpu.matmul %9, %10, %cst_7 {dimension_numbers = #tpu.dot_dimension_numbers<[1], [0], [0], [1], [0, 0, 1, 1], [], []>} : vector<256x4xbf16>, vector<4x4xbf16>, vector<256x4xf32> -> vector<256x4xf32>
    %c0_8 = arith.constant 0 : index
    %c0_9 = arith.constant 0 : index
    %12 = vector.load %arg5[%c0_8, %c0_9] : memref<256x4xf32, #tpu.memory_space<vmem>>, vector<256x4xf32>
    tpu.vector_store %arg5[%c0_8, %c0_9], %11 {strides = array<i32>} : memref<256x4xf32, #tpu.memory_space<vmem>>, vector<256x4xf32>,
    %cst_10 = arith.constant dense<0.000000e+00> : vector<4xf32>
    %13 = vector.multi_reduction <add>, %11, %cst_10 [0] : vector<256x4xf32> to vector<4xf32>
    %14 = vector.shape_cast %13 : vector<4xf32> to vector<1x4xf32>
    %15 = vector.shape_cast %14 : vector<1x4xf32> to vector<1x1x4xf32>
    %c0_11 = arith.constant 0 : index
    %c0_12 = arith.constant 0 : index
    %c0_13 = arith.constant 0 : index
    %16 = vector.load %arg6[%c0_11, %c0_12, %c0_13] : memref<1x1x4xf32, #tpu.memory_space<vmem>>, vector<1x1x4xf32>
    tpu.vector_store %arg6[%c0_11, %c0_12, %c0_13], %15 {strides = array<i32>} : memref<1x1x4xf32, #tpu.memory_space<vmem>>, vector<1x1x4xf32>,
    %17 = arith.mulf %11, %11 : vector<256x4xf32>
    %cst_14 = arith.constant dense<0.000000e+00> : vector<4xf32>
    %18 = vector.multi_reduction <add>, %17, %cst_14 [0] : vector<256x4xf32> to vector<4xf32>
    %19 = vector.shape_cast %18 : vector<4xf32> to vector<1x4xf32>
    %20 = vector.shape_cast %19 : vector<1x4xf32> to vector<1x1x4xf32>
    %c0_15 = arith.constant 0 : index
    %c0_16 = arith.constant 0 : index
    %c0_17 = arith.constant 0 : index
    %21 = vector.load %arg7[%c0_15, %c0_16, %c0_17] : memref<1x1x4xf32, #tpu.memory_space<vmem>>, vector<1x1x4xf32>
    tpu.vector_store %arg7[%c0_15, %c0_16, %c0_17], %20 {strides = array<i32>} : memref<1x1x4xf32, #tpu.memory_space<vmem>>, vector<1x1x4xf32>,
    return
  }
  func.func @transform_0(%arg0: i32) -> (i32, i32) {
    %c0_i32 = arith.constant 0 : i32
    %c0_i32_0 = arith.constant 0 : i32
    return %arg0, %c0_i32 : i32, i32
  }
  func.func @transform_1(%arg0: i32) -> (i32, i32) {
    %c0_i32 = arith.constant 0 : i32
    %c0_i32_0 = arith.constant 0 : i32
    %c0_i32_1 = arith.constant 0 : i32
    return %c0_i32, %c0_i32_0 : i32, i32
  }
  func.func @transform_2(%arg0: i32) -> (i32, i32) {
    %c0_i32 = arith.constant 0 : i32
    %c0_i32_0 = arith.constant 0 : i32
    %c0_i32_1 = arith.constant 0 : i32
    return %c0_i32, %c0_i32_0 : i32, i32
  }
  func.func @transform_3(%arg0: i32) -> (i32, i32) {
    %c0_i32 = arith.constant 0 : i32
    %c0_i32_0 = arith.constant 0 : i32
    %c0_i32_1 = arith.constant 0 : i32
    return %c0_i32, %c0_i32_0 : i32, i32
  }
  func.func @transform_4(%arg0: i32) -> (i32, i32) {
    %c0_i32 = arith.constant 0 : i32
    %c0_i32_0 = arith.constant 0 : i32
    return %arg0, %c0_i32 : i32, i32
  }
  func.func @transform_5(%arg0: i32) -> (i32, i32, i32) {
    %c0_i32 = arith.constant 0 : i32
    %c0_i32_0 = arith.constant 0 : i32
    %c0_i32_1 = arith.constant 0 : i32
    return %arg0, %c0_i32, %c0_i32_0 : i32, i32, i32
  }
  func.func @transform_6(%arg0: i32) -> (i32, i32, i32) {
    %c0_i32 = arith.constant 0 : i32
    %c0_i32_0 = arith.constant 0 : i32
    %c0_i32_1 = arith.constant 0 : i32
    return %arg0, %c0_i32, %c0_i32_0 : i32, i32, i32
  }
}

</mosaic_0001>

<bundles_post_ra>
// kernel: tpu_custom_call.1
= control target key start
LH: loop header
LB: loop body
LE: loop exit
PB: predicated region body
PF: predicated region fallthrough
CT: control target
= control target key end

     0   :  { %12 = vsyncpa [#allocation3], 0  ;;  %s1657_s0 = inlined_call_operand.vmem [shape: f32[512,4], index: 0, kind: input, shape index: {}]   ;;  %s1658_s1 = inlined_call_operand.vmem [shape: f32[1,4], index: 1, kind: input, shape index: {}]   ;;  %s1659_s2 = inlined_call_operand.vmem [shape: f32[1,4], index: 2, kind: input, shape index: {}]   ;;  %s1660_s3 = inlined_call_operand.vmem [shape: bf16[4,4], index: 3, kind: input, shape index: {}]   ;;  %s1661_s4 = inlined_call_operand.vmem [shape: f32[512,4], index: 4, kind: output, shape index: {0}]   ;;  %s1662_s5 = inlined_call_operand.hbm [shape: f32[2,1,4], index: 5, kind: output, shape index: {1}]   ;;  %s1663_s6 = inlined_call_operand.hbm [shape: f32[2,1,4], index: 6, kind: output, shape index: {2}]  }
   0x1   :  { %14 = vsyncpa [#allocation3 + $0x1], 0 }
   0x2   :  { %15 = vsyncpa [#allocation5], 0 }
   0x3   :  { %17 = vsyncpa [#allocation5 + $0x1], 0  ;;  %s1128_s21 = smov 0   ;;  %s1130_s22 = smov 0  }
   0x4   :  { %s1132_s23 = smov 0   ;;  %s1134_s24 = smov 0  }
   0x5 LB: > { %s1149_s25 = sadd.s32 4294967295, %s1091_s24   ;;  %s922_s26 = sadd.s32 4294967294, %s1091_s24   ;;  %s1091_s24 = sphi %s1134_s24, %s1669_s24   ;;  %s1087_s23 = sphi %s1132_s23, %s1668_s23   ;;  %s1083_s22 = sphi %s1130_s22, %s1667_s22   ;;  %s1079_s21 = sphi %s1128_s21, %s1666_s21  }
   0x6   : > { %s1153_s27 = sadd.s32 1, %s1091_s24   ;;  %s145_s28 = sadd.s32 1, %s1087_s23 }
   0x7   : > { %s142_s29 = ssub.s32 %s1091_s24, %s1153_s27  ;;  %p155_p0 = scmp.ne.s32.totalorder %s1087_s23, %s1083_s22 }
   0x8   : > { %p143_p1 = scmp.eq.s32.totalorder %s142_s29, 0  ;;  %p156_p2 = scmp.eq.s32.totalorder %s1149_s25, 1 }
   0x9   : > { %p161_p3 = scmp.ne.s32.totalorder %s1083_s22, %s1079_s21  ;;  %p162_p4 = scmp.eq.s32.totalorder %s922_s26, 1 }
   0xa   : > { %s1164_s30 = scalar_select %p143_p1, %s1087_s23, %s145_s28  }
   0xb   : > { %p1166_p5 = por %p156_p2, %p155_p0  ;;  %p1170_p6 = por %p162_p4, %p161_p3 }
   0xc   : > { %p925_p7 = scmp.ge.s32.totalorder %s1091_s24, 1  ;;  %p224_p8 = scmp.lt.s32.totalorder %s1091_s24, 3 }
   0xe   : > { %p225_p9 = pnand %p925_p7, %p224_p8 }
   0xf   : > { %s926_s11 = sshll.u32 (!%p225_p9), %s1149_s25, 5  ;;  %s1586_s29 = sand.u32 (!%p225_p9), 1, %s1083_s22  }
  0x10   : > { %228 = sbr.rel (%p225_p9) target bundleno = 293 (0x125), region = 36  ;;  %p263_p10 = scmp.lt.s32.totalorder (!%p225_p9), %s926_s11, 63 }
  0x11   : > { %s255_s15 = scalar_lea.vmem (!%p225_p9), [#allocation2], %s1586_s29  ;;  %s261_s18 = scalar_lea.vmem (!%p225_p9), [#allocation4], %s1586_s29 }
  0x12   : > { %s1597_s16 = sshll.u32 (!%p225_p9), %s255_s15, 4  ;;  %s1602_s19 = sshll.u32 (!%p225_p9), %s261_s18, 4  ;;  %s800_s16 = int_to_ptr.vmem [resolvable:$true] %s1597_s16  ;;  %s813_s19 = int_to_ptr.vmem [resolvable:$true] %s1602_s19 }
  0x15   : > { %v427_v0 = vld [vmem:[%s1660_s3] sm:$0x3]  ;;  %vm477_vm0 = vcmask 1041408   ;;  %s1671_s11 = smov (!%p263_p10, %s926_s11), 63  ;;  %vm428_vm1 = vcmask 31744   ;;  %vm671_vm2 = vcmask 24576  }
  0x16   : > { %v479_v1 = vsel %vm477_vm0, %v427_v0, 0  ;;  %v1185_v2 = vld [vmem:[%s1658_s1] ss:$0 sm:$0xff]  ;;  %s927_s14 = sshll.u32 %s1671_s11, 3  ;;  %s797_s11 = scalar_lea.hbm %s1662_s5, %s1149_s25 }
  0x17   : > { %488 = vmatpush.bf16.msra.mxu0 %v479_v1  ;;  %948 = vmatpush.bf16.msra.mxu1 %v479_v1  ;;  %s1193_s17 = scalar_lea.vmem %s1657_s0, %s927_s14  ;;  %v1198_v3 = vld [vmem:[%s1659_s2] ss:$0 sm:$0xff]  ;;  %s1317_s28 = scalar_lea.vmem %s1661_s4, %s927_s14 }
  0x18   : > { %949 = vmatpush.bf16.msra.mxu2 %v479_v1  ;;  %950 = vmatpush.bf16.msra.mxu3 %v479_v1  ;;  %v275_v4 = vld [vmem:[%s1193_s17] sm:$0xff]  ;;  %v276_v5 = vld [vmem:[%s1193_s17 + $0x8] sm:$0xff]  ;;  %v277_v25 = vld [vmem:[%s1193_s17 + $0x10] sm:$0xff]  ;;  %s810_s14 = scalar_lea.hbm %s1663_s6, %s1149_s25  ;;  %s781_s25 = scalar_lea.sflag [#allocation3], %s1586_s29 }
  0x19   : > { %v283_v6 = vld [vmem:[%s1193_s17 + $0x40] sm:$0xff]  ;;  %v311_v7 = vmul.f32 %v1185_v2, %v275_v4  ;;  %v312_v8 = vmul.f32 %v1185_v2, %v276_v5  ;;  %v284_v9 = vld [vmem:[%s1193_s17 + $0x48] sm:$0xff]  ;;  %v278_v26 = vld [vmem:[%s1193_s17 + $0x18] sm:$0xff]  ;;  %v313_v35 = vmul.f32 %v1185_v2, %v277_v25  ;;  %s1604_s20 = sshll.u32 %s810_s14, 4  ;;  %s815_s20 = int_to_ptr.hbm [resolvable:$true] %s1604_s20 }
  0x1a   : > { %v319_v10 = vmul.f32 %v1185_v2, %v283_v6  ;;  %v320_v11 = vmul.f32 %v1185_v2, %v284_v9  ;;  %v291_v12 = vld [vmem:[%s1193_s17 + $0x80] sm:$0xff]  ;;  %v292_v13 = vld [vmem:[%s1193_s17 + $0x88] sm:$0xff]  ;;  %v285_v30 = vld [vmem:[%s1193_s17 + $0x50] sm:$0xff]  ;;  %v314_v36 = vmul.f32 %v1185_v2, %v278_v26 }
  0x1b   : > { %v347_v14 = vadd.f32 %v1198_v3, %v311_v7  ;;  %v348_v15 = vadd.f32 %v1198_v3, %v312_v8  ;;  %v327_v17 = vmul.f32 %v1185_v2, %v291_v12  ;;  %v328_v19 = vmul.f32 %v1185_v2, %v292_v13  ;;  %v286_v31 = vld [vmem:[%s1193_s17 + $0x58] sm:$0xff]  ;;  %v299_v32 = vld [vmem:[%s1193_s17 + $0xc0] sm:$0xff]  ;;  %v293_v37 = vld [vmem:[%s1193_s17 + $0x90] sm:$0xff] }
  0x1c   : > { %v355_v16 = vadd.f32 %v1198_v3, %v319_v10  ;;  %v356_v18 = vadd.f32 %v1198_v3, %v320_v11  ;;  %v294_v38 = vld [vmem:[%s1193_s17 + $0x98] sm:$0xff]  ;;  %v300_v39 = vld [vmem:[%s1193_s17 + $0xc8] sm:$0xff]  ;;  %v321_v41 = vmul.f32 %v1185_v2, %v285_v30  ;;  %v322_v42 = vmul.f32 %v1185_v2, %v286_v31  ;;  %v301_v62 = vld [vmem:[%s1193_s17 + $0xd0] sm:$0xff] }
  0x1d   : > { %v379_v20 = vmax.f32 %v347_v14, 0.0  ;;  %v380_v21 = vmax.f32 %v348_v15, 0.0  ;;  %v363_v23 = vadd.f32 %v1198_v3, %v327_v17  ;;  %v364_v27 = vadd.f32 %v1198_v3, %v328_v19  ;;  %v302_v63 = vld [vmem:[%s1193_s17 + $0xd8] sm:$0xff]  ;;  %v279_v8 = vld [vmem:[%s1193_s17 + $0x20] sm:$0xff]  ;;  %v280_v9 = vld [vmem:[%s1193_s17 + $0x28] sm:$0xff] }
  0x1e   : > { %v387_v22 = vmax.f32 %v355_v16, 0.0  ;;  %v388_v24 = vmax.f32 %v356_v18, 0.0  ;;  %v335_v43 = vmul.f32 %v1185_v2, %v299_v32  ;;  %v329_v44 = vmul.f32 %v1185_v2, %v293_v37  ;;  %v287_v10 = vld [vmem:[%s1193_s17 + $0x60] sm:$0xff]  ;;  %v288_v11 = vld [vmem:[%s1193_s17 + $0x68] sm:$0xff] }
  0x1f   : > { %v411_v28 = vpack.c.bf16 %v380_v21, %v379_v20  ;;  %v395_v29 = vmax.f32 %v363_v23, 0.0  ;;  %v396_v34 = vmax.f32 %v364_v27, 0.0  ;;  %v330_v45 = vmul.f32 %v1185_v2, %v294_v38  ;;  %v295_v17 = vld [vmem:[%s1193_s17 + $0xa0] sm:$0xff]  ;;  %v296_v18 = vld [vmem:[%s1193_s17 + $0xa8] sm:$0xff] }
  0x20   : > { %v415_v33 = vpack.c.bf16 %v388_v24, %v387_v22  ;;  %v336_v46 = vmul.f32 %v1185_v2, %v300_v39  ;;  %v371_v47 = vadd.f32 %v1198_v3, %v335_v43  ;;  %v349_v48 = vadd.f32 %v1198_v3, %v313_v35  ;;  %v304_v35 = vld [vmem:[%s1193_s17 + $0xe8] sm:$0xff] }
  0x21   : > { %930 = vmatmul.msk.bf16.vlgmr.msra.gmra.mxu0 %vm428_vm1, %v411_v28  ;;  %v419_v40 = vpack.c.bf16 %v396_v34, %v395_v29  ;;  %v350_v49 = vadd.f32 %v1198_v3, %v314_v36  ;;  %v357_v50 = vadd.f32 %v1198_v3, %v321_v41  ;;  %v358_v51 = vadd.f32 %v1198_v3, %v322_v42  ;;  %v303_v34 = vld [vmem:[%s1193_s17 + $0xe0] sm:$0xff] }
  0x22   : > { %934 = vmatmul.msk.bf16.vlgmr.msra.gmra.mxu1 %vm428_vm1, %v415_v33  ;;  %v372_v52 = vadd.f32 %v1198_v3, %v336_v46  ;;  %v403_v53 = vmax.f32 %v371_v47, 0.0  ;;  %v365_v54 = vadd.f32 %v1198_v3, %v329_v44  ;;  %v366_v55 = vadd.f32 %v1198_v3, %v330_v45  ;;  %v281_v44 = vld [vmem:[%s1193_s17 + $0x30] sm:$0xff]  ;;  %v282_v45 = vld [vmem:[%s1193_s17 + $0x38] sm:$0xff] }
  0x23   : > { %938 = vmatmul.msk.bf16.vlgmr.msra.gmra.mxu2 %vm428_vm1, %v419_v40  ;;  %v381_v57 = vmax.f32 %v349_v48, 0.0  ;;  %v382_v58 = vmax.f32 %v350_v49, 0.0  ;;  %v389_v59 = vmax.f32 %v357_v50, 0.0  ;;  %v390_v60 = vmax.f32 %v358_v51, 0.0  ;;  %v289_v46 = vld [vmem:[%s1193_s17 + $0x70] sm:$0xff]  ;;  %v290_v47 = vld [vmem:[%s1193_s17 + $0x78] sm:$0xff] }
  0x24   : > { %v404_v56 = vmax.f32 %v372_v52, 0.0  ;;  %v397_v0 = vmax.f32 %v365_v54, 0.0  ;;  %v398_v1 = vmax.f32 %v366_v55, 0.0  ;;  %v337_v4 = vmul.f32 %v1185_v2, %v301_v62  ;;  %v298_v54 = vld [vmem:[%s1193_s17 + $0xb8] sm:$0xff] }
  0x25   : > { %v338_v5 = vmul.f32 %v1185_v2, %v302_v63  ;;  %v412_v6 = vpack.c.bf16 %v382_v58, %v381_v57  ;;  %v416_v7 = vpack.c.bf16 %v390_v60, %v389_v59  ;;  %v315_v15 = vmul.f32 %v1185_v2, %v279_v8  ;;  %v305_v8 = vld [vmem:[%s1193_s17 + $0xf0] sm:$0xff] }
  0x26   : > { %v423_v61 = vpack.c.bf16 %v404_v56, %v403_v53  ;;  %v420_v12 = vpack.c.bf16 %v398_v1, %v397_v0  ;;  %v373_v13 = vadd.f32 %v1198_v3, %v337_v4  ;;  %v316_v16 = vmul.f32 %v1185_v2, %v280_v9  ;;  %v297_v53 = vld [vmem:[%s1193_s17 + $0xb0] sm:$0xff]  ;;  %v306_v9 = vld [vmem:[%s1193_s17 + $0xf8] sm:$0xff]  ;;  %s1599_s17 = sshll.u32 %s797_s11, 4  ;;  %s1017_s11 = scalar_lea.hbm %s1662_s5, 2  ;;  %s802_s17 = int_to_ptr.hbm [resolvable:$true] %s1599_s17 }
  0x27   : > { %v374_v14 = vadd.f32 %v1198_v3, %v338_v5  ;;  %v323_v19 = vmul.f32 %v1185_v2, %v287_v10  ;;  %v324_v20 = vmul.f32 %v1185_v2, %v288_v11  ;;  %v331_v21 = vmul.f32 %v1185_v2, %v295_v17  ;;  %s1011_s26 = sshra.s32 %s802_s17, 4  ;;  %s1012_s26 = int_to_ptr.hbm [resolvable:$true] %s1011_s26 }
  0x28   : > { %942 = vmatmul.msk.bf16.vlgmr.msra.gmra.mxu3 %vm428_vm1, %v423_v61  ;;  %v332_v22 = vmul.f32 %v1185_v2, %v296_v18  ;;  %v405_v23 = vmax.f32 %v373_v13, 0.0  ;;  %v351_v25 = vadd.f32 %v1198_v3, %v315_v15  ;;  %v352_v26 = vadd.f32 %v1198_v3, %v316_v16  ;;  %p1018_p0 = scmp.lt.s32.totalorder %s1012_s26, %s1662_s5 }
  0x29   : > { %v406_v24 = vmax.f32 %v374_v14, 0.0  ;;  %v359_v27 = vadd.f32 %v1198_v3, %v323_v19  ;;  %v360_v28 = vadd.f32 %v1198_v3, %v324_v20  ;;  %v367_v29 = vadd.f32 %v1198_v3, %v331_v21 }
  0x2a   : > { %v368_v30 = vadd.f32 %v1198_v3, %v332_v22  ;;  %v383_v32 = vmax.f32 %v351_v25, 0.0  ;;  %v384_v33 = vmax.f32 %v352_v26, 0.0  ;;  %v339_v40 = vmul.f32 %v1185_v2, %v303_v34 }
  0x2b   : > { %v424_v31 = vpack.c.bf16 %v406_v24, %v405_v23  ;;  %v391_v36 = vmax.f32 %v359_v27, 0.0  ;;  %v392_v37 = vmax.f32 %v360_v28, 0.0  ;;  %v399_v38 = vmax.f32 %v367_v29, 0.0 }
  0x2c   : > { %v400_v39 = vmax.f32 %v368_v30, 0.0  ;;  %v340_v41 = vmul.f32 %v1185_v2, %v304_v35  ;;  %v413_v42 = vpack.c.bf16 %v384_v33, %v383_v32  ;;  %v375_v49 = vadd.f32 %v1198_v3, %v339_v40 }
  0x2d   : > { %v417_v43 = vpack.c.bf16 %v392_v37, %v391_v36  ;;  %v317_v51 = vmul.f32 %v1185_v2, %v281_v44  ;;  %v318_v52 = vmul.f32 %v1185_v2, %v282_v45  ;;  %v325_v55 = vmul.f32 %v1185_v2, %v289_v46 }
  0x2e   : > { %v421_v48 = vpack.c.bf16 %v400_v39, %v399_v38  ;;  %v376_v50 = vadd.f32 %v1198_v3, %v340_v41  ;;  %v326_v56 = vmul.f32 %v1185_v2, %v290_v47  ;;  %v333_v57 = vmul.f32 %v1185_v2, %v297_v53 }
  0x2f   : > { %v334_v58 = vmul.f32 %v1185_v2, %v298_v54  ;;  %v407_v59 = vmax.f32 %v375_v49, 0.0  ;;  %v353_v61 = vadd.f32 %v1198_v3, %v317_v51  ;;  %v354_v62 = vadd.f32 %v1198_v3, %v318_v52 }
  0x30   : > { %v408_v60 = vmax.f32 %v376_v50, 0.0  ;;  %v361_v63 = vadd.f32 %v1198_v3, %v325_v55  ;;  %v362_v0 = vadd.f32 %v1198_v3, %v326_v56  ;;  %v369_v1 = vadd.f32 %v1198_v3, %v333_v57 }
  0x31   : > { %931 = vmatmul.msk.bf16.gmra.mxu0 %vm428_vm1, %v412_v6  ;;  %v370_v4 = vadd.f32 %v1198_v3, %v334_v58  ;;  %v385_v6 = vmax.f32 %v353_v61, 0.0  ;;  %v341_v14 = vmul.f32 %v1185_v2, %v305_v8  ;;  %v342_v15 = vmul.f32 %v1185_v2, %v306_v9 }
  0x32   : > { %935 = vmatmul.msk.bf16.gmra.mxu1 %vm428_vm1, %v416_v7  ;;  %v425_v5 = vpack.c.bf16 %v408_v60, %v407_v59  ;;  %v386_v7 = vmax.f32 %v354_v62, 0.0  ;;  %v393_v10 = vmax.f32 %v361_v63, 0.0  ;;  %v394_v11 = vmax.f32 %v362_v0, 0.0 }
  0x33   : > { %939 = vmatmul.msk.bf16.gmra.mxu2 %vm428_vm1, %v420_v12  ;;  %v401_v12 = vmax.f32 %v369_v1, 0.0  ;;  %v402_v13 = vmax.f32 %v370_v4, 0.0  ;;  %v377_v19 = vadd.f32 %v1198_v3, %v341_v14  ;;  %v378_v20 = vadd.f32 %v1198_v3, %v342_v15 }
  0x34   : > { %v414_v16 = vpack.c.bf16 %v386_v7, %v385_v6  ;;  %v418_v17 = vpack.c.bf16 %v394_v11, %v393_v10 }
  0x35   : > { %v422_v18 = vpack.c.bf16 %v402_v13, %v401_v12  ;;  %v409_v21 = vmax.f32 %v377_v19, 0.0  ;;  %v410_v22 = vmax.f32 %v378_v20, 0.0 }
  0x37   : > { %v426_v23 = vpack.c.bf16 %v410_v22, %v409_v21 }
  0x38   : > { %943 = vmatmul.msk.bf16.gmra.mxu3 %vm428_vm1, %v424_v31 }
  0x41   : > { %932 = vmatmul.msk.bf16.gmra.mxu0 %vm428_vm1, %v413_v42 }
  0x42   : > { %936 = vmatmul.msk.bf16.gmra.mxu1 %vm428_vm1, %v417_v43 }
  0x43   : > { %940 = vmatmul.msk.bf16.gmra.mxu2 %vm428_vm1, %v421_v48 }
  0x48   : > { %944 = vmatmul.msk.bf16.gmra.mxu3 %vm428_vm1, %v425_v5 }
  0x51   : > { %933 = vmatmul.msk.bf16.gmra.mxu0 %vm428_vm1, %v414_v16 }
  0x52   : > { %937 = vmatmul.msk.bf16.gmra.mxu1 %vm428_vm1, %v418_v17 }
  0x53   : > { %941 = vmatmul.msk.bf16.gmra.mxu2 %vm428_vm1, %v422_v18 }
  0x58   : > { %945 = vmatmul.msk.bf16.gmra.mxu3 %vm428_vm1, %v426_v23 }
  0x9e   : > { %v490_v2 = vpop.f32.mrf.mxu0 }
  0x9f   : > { %570 = vst.msk [vmem:[%s1317_s28] sm:$0xff] %vm428_vm1, %v490_v2  ;;  %v1321_v3 = vpop.f32.mrf.mxu1  ;;  %v673_v44 = vmul.f32 %v490_v2, %v490_v2  ;;  %v602_v47 = vsel %vm428_vm1, %v490_v2, 0.0 }
  0xa0   : > { %578 = vst.msk [vmem:[%s1317_s28 + $0x40] sm:$0xff] %vm428_vm1, %v1321_v3  ;;  %v681_v18 = vmul.f32 %v1321_v3, %v1321_v3 }
  0xa1   : > { %v705_v52 = vsel %vm428_vm1, %v673_v44, 0.0 }
  0xa2   : > { %v720_v44 = vsel %vm428_vm1, %v681_v18, 0.0 }
  0xa6   : > { %v492_v24 = vpop.f32.mrf.mxu0  ;;  %v1330_v26 = vpop.f32.mrf.mxu2 }
  0xa7   : > { %571 = vst.msk [vmem:[%s1317_s28 + $0x8] sm:$0xff] %vm428_vm1, %v492_v24  ;;  %v1328_v25 = vpop.f32.mrf.mxu1  ;;  %v674_v40 = vmul.f32 %v492_v24, %v492_v24  ;;  %v603_v45 = vsel %vm428_vm1, %v492_v24, 0.0 }
  0xa8   : > { %579 = vst.msk [vmem:[%s1317_s28 + $0x48] sm:$0xff] %vm428_vm1, %v1328_v25  ;;  %v604_v51 = vadd.f32 %v603_v45, %v602_v47  ;;  %v619_v45 = vsel %vm428_vm1, %v1328_v25, 0.0 }
  0xa9   : > { %586 = vst.msk [vmem:[%s1317_s28 + $0x80] sm:$0xff] %vm428_vm1, %v1330_v26  ;;  %v706_v48 = vsel %vm428_vm1, %v674_v40, 0.0 }
  0xaa   : > { %v707_v56 = vadd.f32 %v706_v48, %v705_v52 }
  0xab   : > { %v1347_v30 = vpop.f32.mrf.mxu3 }
  0xac   : > { %594 = vst.msk [vmem:[%s1317_s28 + $0xc0] sm:$0xff] %vm428_vm1, %v1347_v30 }
  0xae   : > { %v495_v27 = vpop.f32.mrf.mxu0  ;;  %v1342_v29 = vpop.f32.mrf.mxu2 }
  0xaf   : > { %572 = vst.msk [vmem:[%s1317_s28 + $0x10] sm:$0xff] %vm428_vm1, %v495_v27  ;;  %v1340_v28 = vpop.f32.mrf.mxu1  ;;  %v675_v46 = vmul.f32 %v495_v27, %v495_v27  ;;  %v605_v49 = vsel %vm428_vm1, %v495_v27, 0.0  ;;  %v617_v27 = vsel %vm428_vm1, %v1321_v3, 0.0 }
  0xb0   : > { %580 = vst.msk [vmem:[%s1317_s28 + $0x50] sm:$0xff] %vm428_vm1, %v1340_v28  ;;  %v606_v57 = vadd.f32 %v605_v49, %v604_v51  ;;  %v683_v3 = vmul.f32 %v1340_v28, %v1340_v28  ;;  %v621_v49 = vsel %vm428_vm1, %v1340_v28, 0.0 }
  0xb1   : > { %587 = vst.msk [vmem:[%s1317_s28 + $0x88] sm:$0xff] %vm428_vm1, %v1342_v29  ;;  %v708_v53 = vsel %vm428_vm1, %v675_v46, 0.0 }
  0xb2   : > { %v709_v0 = vadd.f32 %v708_v53, %v707_v56  ;;  %v724_v53 = vsel %vm428_vm1, %v683_v3, 0.0 }
  0xb3   : > { %v1364_v34 = vpop.f32.mrf.mxu3 }
  0xb4   : > { %595 = vst.msk [vmem:[%s1317_s28 + $0xc8] sm:$0xff] %vm428_vm1, %v1364_v34 }
  0xb6   : > { %v497_v31 = vpop.f32.mrf.mxu0  ;;  %v1359_v33 = vpop.f32.mrf.mxu2 }
  0xb7   : > { %573 = vst.msk [vmem:[%s1317_s28 + $0x18] sm:$0xff] %vm428_vm1, %v497_v31  ;;  %v1357_v32 = vpop.f32.mrf.mxu1  ;;  %v676_v50 = vmul.f32 %v497_v31, %v497_v31  ;;  %v607_v54 = vsel %vm428_vm1, %v497_v31, 0.0  ;;  %v682_v31 = vmul.f32 %v1328_v25, %v1328_v25 }
  0xb8   : > { %581 = vst.msk [vmem:[%s1317_s28 + $0x58] sm:$0xff] %vm428_vm1, %v1357_v32  ;;  %v608_v1 = vadd.f32 %v607_v54, %v606_v57  ;;  %v623_v25 = vsel %vm428_vm1, %v1357_v32, 0.0 }
  0xb9   : > { %588 = vst.msk [vmem:[%s1317_s28 + $0x90] sm:$0xff] %vm428_vm1, %v1359_v33  ;;  %v710_v59 = vsel %vm428_vm1, %v676_v50, 0.0  ;;  %v722_v48 = vsel %vm428_vm1, %v682_v31, 0.0  ;;  %v684_v50 = vmul.f32 %v1357_v32, %v1357_v32 }
  0xba   : > { %v711_v8 = vadd.f32 %v710_v59, %v709_v0 }
  0xbb   : > { %v1381_v38 = vpop.f32.mrf.mxu3 }
  0xbc   : > { %596 = vst.msk [vmem:[%s1317_s28 + $0xd0] sm:$0xff] %vm428_vm1, %v1381_v38 }
  0xbe   : > { %v500_v35 = vpop.f32.mrf.mxu0  ;;  %v1376_v37 = vpop.f32.mrf.mxu2 }
  0xbf   : > { %574 = vst.msk [vmem:[%s1317_s28 + $0x20] sm:$0xff] %vm428_vm1, %v500_v35  ;;  %v1374_v36 = vpop.f32.mrf.mxu1  ;;  %v677_v55 = vmul.f32 %v500_v35, %v500_v35  ;;  %v609_v60 = vsel %vm428_vm1, %v500_v35, 0.0 }
  0xc0   : > { %582 = vst.msk [vmem:[%s1317_s28 + $0x60] sm:$0xff] %vm428_vm1, %v1374_v36  ;;  %v610_v9 = vadd.f32 %v609_v60, %v608_v1  ;;  %v685_v54 = vmul.f32 %v1374_v36, %v1374_v36  ;;  %v625_v59 = vsel %vm428_vm1, %v1374_v36, 0.0 }
  0xc1   : > { %589 = vst.msk [vmem:[%s1317_s28 + $0x98] sm:$0xff] %vm428_vm1, %v1376_v37  ;;  %v712_v5 = vsel %vm428_vm1, %v677_v55, 0.0 }
  0xc2   : > { %v713_v12 = vadd.f32 %v712_v5, %v711_v8  ;;  %v728_v0 = vsel %vm428_vm1, %v685_v54, 0.0 }
  0xc3   : > { %v1398_v43 = vpop.f32.mrf.mxu3 }
  0xc4   : > { %597 = vst.msk [vmem:[%s1317_s28 + $0xd8] sm:$0xff] %vm428_vm1, %v1398_v43 }
  0xc6   : > { %v502_v39 = vpop.f32.mrf.mxu0  ;;  %v1393_v42 = vpop.f32.mrf.mxu2 }
  0xc7   : > { %575 = vst.msk [vmem:[%s1317_s28 + $0x28] sm:$0xff] %vm428_vm1, %v502_v39  ;;  %v1391_v41 = vpop.f32.mrf.mxu1  ;;  %v678_v61 = vmul.f32 %v502_v39, %v502_v39  ;;  %v611_v6 = vsel %vm428_vm1, %v502_v39, 0.0  ;;  %v693_v3 = vmul.f32 %v1393_v42, %v1393_v42 }
  0xc8   : > { %583 = vst.msk [vmem:[%s1317_s28 + $0x68] sm:$0xff] %vm428_vm1, %v1391_v41  ;;  %v612_v13 = vadd.f32 %v611_v6, %v610_v9  ;;  %v686_v32 = vmul.f32 %v1391_v41, %v1391_v41  ;;  %v627_v1 = vsel %vm428_vm1, %v1391_v41, 0.0 }
  0xc9   : > { %590 = vst.msk [vmem:[%s1317_s28 + $0xa0] sm:$0xff] %vm428_vm1, %v1393_v42  ;;  %v714_v10 = vsel %vm428_vm1, %v678_v61, 0.0 }
  0xca   : > { %v715_v15 = vadd.f32 %v714_v10, %v713_v12  ;;  %v730_v36 = vsel %vm428_vm1, %v686_v32, 0.0  ;;  %v689_v12 = vmul.f32 %v1330_v26, %v1330_v26  ;;  %v697_v32 = vmul.f32 %v1347_v30, %v1347_v30 }
  0xcb   : > { %v1424_v4 = vpop.f32.mrf.mxu3 }
  0xcc   : > { %598 = vst.msk [vmem:[%s1317_s28 + $0xe0] sm:$0xff] %vm428_vm1, %v1424_v4 }
  0xce   : > { %v505_v58 = vpop.f32.mrf.mxu0  ;;  %v1419_v63 = vpop.f32.mrf.mxu2 }
  0xcf   : > { %576 = vst.msk [vmem:[%s1317_s28 + $0x30] sm:$0xff] %vm428_vm1, %v505_v58  ;;  %v1417_v62 = vpop.f32.mrf.mxu1  ;;  %v679_v7 = vmul.f32 %v505_v58, %v505_v58  ;;  %v613_v11 = vsel %vm428_vm1, %v505_v58, 0.0  ;;  %v726_v58 = vsel %vm428_vm1, %v684_v50, 0.0 }
  0xd0   : > { %584 = vst.msk [vmem:[%s1317_s28 + $0x70] sm:$0xff] %vm428_vm1, %v1417_v62  ;;  %v614_v16 = vadd.f32 %v613_v11, %v612_v13  ;;  %v687_v5 = vmul.f32 %v1417_v62, %v1417_v62  ;;  %v629_v8 = vsel %vm428_vm1, %v1417_v62, 0.0  ;;  %v690_v62 = vmul.f32 %v1342_v29, %v1342_v29 }
  0xd1   : > { %591 = vst.msk [vmem:[%s1317_s28 + $0xa8] sm:$0xff] %vm428_vm1, %v1419_v63  ;;  %v716_v14 = vsel %vm428_vm1, %v679_v7, 0.0 }
  0xd2   : > { %v717_v23 = vadd.f32 %v716_v14, %v715_v15  ;;  %v732_v13 = vsel %vm428_vm1, %v687_v5, 0.0  ;;  %v738_v31 = vsel %vm428_vm1, %v690_v62, 0.0 }
  0xd3   : > { %v1446_v24 = vpop.f32.mrf.mxu3 }
  0xd4   : > { %599 = vst.msk [vmem:[%s1317_s28 + $0xe8] sm:$0xff] %vm428_vm1, %v1446_v24 }
  0xd6   : > { %v507_v17 = vpop.f32.mrf.mxu0  ;;  %v1442_v22 = vpop.f32.mrf.mxu2 }
  0xd7   : > { %577 = vst.msk [vmem:[%s1317_s28 + $0x38] sm:$0xff] %vm428_vm1, %v507_v17  ;;  %v615_v19 = vsel %vm428_vm1, %v507_v17, 0.0  ;;  %v680_v20 = vmul.f32 %v507_v17, %v507_v17  ;;  %v527_v21 = vpop.f32.mrf.mxu1  ;;  %v633_v17 = vsel %vm428_vm1, %v1330_v26, 0.0 }
  0xd8   : > { %v616_v2 = vadd.f32 %v615_v19, %v614_v16  ;;  %585 = vst.msk [vmem:[%s1317_s28 + $0x78] sm:$0xff] %vm428_vm1, %v527_v21  ;;  %v688_v9 = vmul.f32 %v527_v21, %v527_v21  ;;  %v631_v41 = vsel %vm428_vm1, %v527_v21, 0.0  ;;  %v635_v21 = vsel %vm428_vm1, %v1342_v29, 0.0 }
  0xd9   : > { %v718_v35 = vsel %vm428_vm1, %v680_v20, 0.0  ;;  %592 = vst.msk [vmem:[%s1317_s28 + $0xb0] sm:$0xff] %vm428_vm1, %v1442_v22  ;;  %v639_v29 = vsel %vm428_vm1, %v1376_v37, 0.0 }
  0xda   : > { %v618_v39 = vadd.f32 %v617_v27, %v616_v2  ;;  %v719_v40 = vadd.f32 %v718_v35, %v717_v23  ;;  %v734_v18 = vsel %vm428_vm1, %v688_v9, 0.0  ;;  %v736_v23 = vsel %vm428_vm1, %v689_v12, 0.0 }
  0xdb   : > { %v1479_v28 = vpop.f32.mrf.mxu3  ;;  %v691_v2 = vmul.f32 %v1359_v33, %v1359_v33  ;;  %v637_v35 = vsel %vm428_vm1, %v1359_v33, 0.0  ;;  %v641_v33 = vsel %vm428_vm1, %v1393_v42, 0.0  ;;  %v645_v42 = vsel %vm428_vm1, %v1442_v22, 0.0 }
  0xdc   : > { %v620_v46 = vadd.f32 %v619_v45, %v618_v39  ;;  %v721_v47 = vadd.f32 %v720_v44, %v719_v40  ;;  %600 = vst.msk [vmem:[%s1317_s28 + $0xf0] sm:$0xff] %vm428_vm1, %v1479_v28  ;;  %v692_v39 = vmul.f32 %v1376_v37, %v1376_v37  ;;  %v643_v37 = vsel %vm428_vm1, %v1419_v63, 0.0 }
  0xdd   : > { %v740_v45 = vsel %vm428_vm1, %v691_v2, 0.0  ;;  %v700_v12 = vmul.f32 %v1398_v43, %v1398_v43  ;;  %v703_v2 = vmul.f32 %v1479_v28, %v1479_v28 }
  0xde   : > { %v622_v51 = vadd.f32 %v621_v49, %v620_v46  ;;  %v723_v52 = vadd.f32 %v722_v48, %v721_v47  ;;  %v1474_v55 = vpop.f32.mrf.mxu2  ;;  %v742_v48 = vsel %vm428_vm1, %v692_v39, 0.0  ;;  %v694_v49 = vmul.f32 %v1419_v63, %v1419_v63 }
  0xdf   : > { %593 = vst.msk [vmem:[%s1317_s28 + $0xb8] sm:$0xff] %vm428_vm1, %v1474_v55 }
  0xe0   : > { %v725_v56 = vadd.f32 %v724_v53, %v723_v52  ;;  %v624_v57 = vadd.f32 %v623_v25, %v622_v51  ;;  %v744_v52 = vsel %vm428_vm1, %v693_v3, 0.0  ;;  %v695_v53 = vmul.f32 %v1442_v22, %v1442_v22 }
  0xe1   : > { %v698_v22 = vmul.f32 %v1364_v34, %v1364_v34 }
  0xe2   : > { %v626_v60 = vadd.f32 %v625_v59, %v624_v57  ;;  %v727_v61 = vadd.f32 %v726_v58, %v725_v56  ;;  %v746_v56 = vsel %vm428_vm1, %v694_v49, 0.0  ;;  %v696_v57 = vmul.f32 %v1474_v55, %v1474_v55 }
  0xe3   : > { %v1501_v16 = vpop.f32.mrf.mxu3  ;;  %v748_v63 = vsel %vm428_vm1, %v695_v53, 0.0 }
  0xe4   : > { %v628_v6 = vadd.f32 %v627_v1, %v626_v60  ;;  %v729_v7 = vadd.f32 %v728_v0, %v727_v61  ;;  %601 = vst.msk [vmem:[%s1317_s28 + $0xf8] sm:$0xff] %vm428_vm1, %v1501_v16  ;;  %v647_v60 = vsel %vm428_vm1, %v1474_v55, 0.0  ;;  %v649_v1 = vsel %vm428_vm1, %v1347_v30, 0.0  ;;  %s1013_s28 = scalar_lea.hbm %s1012_s26, 1 }
  0xe5   : > { %v750_v5 = vsel %vm428_vm1, %v696_v57, 0.0  ;;  %v699_v55 = vmul.f32 %v1381_v38, %v1381_v38  ;;  %v653_v30 = vsel %vm428_vm1, %v1381_v38, 0.0  ;;  %v657_v38 = vsel %vm428_vm1, %v1424_v4, 0.0  ;;  %p1014_p11 = scmp.ne.s32.totalorder %s1012_s26, %s1013_s28  ;;  %p1019_p1 = scmp.lt.s32.totalorder %s1017_s11, %s1013_s28 }
  0xe6   : > { %v630_v10 = vadd.f32 %v629_v8, %v628_v6  ;;  %v731_v11 = vadd.f32 %v730_v36, %v729_v7  ;;  %v752_v36 = vsel %vm428_vm1, %v697_v32, 0.0  ;;  %v651_v8 = vsel %vm428_vm1, %v1364_v34, 0.0 }
  0xe7   : > { %v655_v34 = vsel %vm428_vm1, %v1398_v43, 0.0  ;;  %v659_v43 = vsel %vm428_vm1, %v1446_v24, 0.0  ;;  %p1015_p12 = pnand %p1014_p11, %p1166_p5  ;;  %p1020_p2 = por %p1019_p1, %p1018_p0 }
  0xe8   : > { %v733_v14 = vadd.f32 %v732_v13, %v731_v11  ;;  %v632_v15 = vadd.f32 %v631_v41, %v630_v10  ;;  %v754_v11 = vsel %vm428_vm1, %v698_v22, 0.0 }
  0xe9   : > { %p1016_p13 = pneg %p1015_p12 }
  0xea   : > { %v634_v19 = vadd.f32 %v633_v17, %v632_v15  ;;  %v735_v20 = vadd.f32 %v734_v18, %v733_v14  ;;  %v756_v14 = vsel %vm428_vm1, %v699_v55, 0.0  ;;  %v701_v15 = vmul.f32 %v1424_v4, %v1424_v4 }
  0xeb   : > { %v758_v18 = vsel %vm428_vm1, %v700_v12, 0.0  ;;  %v661_v4 = vsel %vm428_vm1, %v1479_v28, 0.0  ;;  %p1021_p3 = pnand %p1020_p2, %p1016_p13 }
  0xec   : > { %v636_v27 = vadd.f32 %v635_v21, %v634_v19  ;;  %v737_v26 = vadd.f32 %v736_v23, %v735_v20  ;;  %v702_v19 = vmul.f32 %v1446_v24, %v1446_v24  ;;  %v760_v21 = vsel %vm428_vm1, %v701_v15, 0.0 }
  0xed   : > { %v764_v24 = vsel %vm428_vm1, %v703_v2, 0.0 }
  0xee   : > { %v638_v40 = vadd.f32 %v637_v35, %v636_v27  ;;  %v739_v44 = vadd.f32 %v738_v31, %v737_v26  ;;  %v762_v31 = vsel %vm428_vm1, %v702_v19, 0.0  ;;  %v704_v35 = vmul.f32 %v1501_v16, %v1501_v16 }
  0xf0   : > { %v741_v46 = vadd.f32 %v740_v45, %v739_v44  ;;  %v640_v47 = vadd.f32 %v639_v29, %v638_v40  ;;  %v663_v44 = vsel %vm428_vm1, %v1501_v16, 0.0  ;;  %v766_v3 = vsel %vm428_vm1, %v704_v35, 0.0 }
  0xf2   : > { %v642_v50 = vadd.f32 %v641_v33, %v640_v47  ;;  %v743_v51 = vadd.f32 %v742_v48, %v741_v46 }
  0xf4   : > { %v644_v25 = vadd.f32 %v643_v37, %v642_v50  ;;  %v745_v54 = vadd.f32 %v744_v52, %v743_v51 }
  0xf6   : > { %v747_v58 = vadd.f32 %v746_v56, %v745_v54  ;;  %v646_v59 = vadd.f32 %v645_v42, %v644_v25 }
  0xf8   : > { %v749_v61 = vadd.f32 %v748_v63, %v747_v58  ;;  %v648_v0 = vadd.f32 %v647_v60, %v646_v59 }
  0xfa   : > { %v650_v6 = vadd.f32 %v649_v1, %v648_v0  ;;  %v751_v7 = vadd.f32 %v750_v5, %v749_v61 }
  0xfc   : > { %v652_v9 = vadd.f32 %v651_v8, %v650_v6  ;;  %v753_v10 = vadd.f32 %v752_v36, %v751_v7 }
  0xfe   : > { %v654_v13 = vadd.f32 %v653_v30, %v652_v9  ;;  %v755_v41 = vadd.f32 %v754_v11, %v753_v10 }
 0x100   : > { %v757_v17 = vadd.f32 %v756_v14, %v755_v41  ;;  %v656_v62 = vadd.f32 %v655_v34, %v654_v13 }
 0x102   : > { %v658_v20 = vadd.f32 %v657_v38, %v656_v62  ;;  %v759_v23 = vadd.f32 %v758_v18, %v757_v17 }
 0x104   : > { %v660_v27 = vadd.f32 %v659_v43, %v658_v20  ;;  %v761_v26 = vadd.f32 %v760_v21, %v759_v23 }
 0x106   : > { %v763_v39 = vadd.f32 %v762_v31, %v761_v26  ;;  %v662_v40 = vadd.f32 %v661_v4, %v660_v27 }
 0x108   : > { %v765_v45 = vadd.f32 %v764_v24, %v763_v39  ;;  %v664_v29 = vadd.f32 %v663_v44, %v662_v40 }
 0x10a   : > { %v665_v46 = vrot.slane %v664_v29, 4  ;;  %v767_v47 = vadd.f32 %v766_v3, %v765_v45 }
 0x10c   : > { %v666_v28 = vadd.f32 %v665_v46, %v664_v29  ;;  %v768_v48 = vrot.slane %v767_v47, 4 }
 0x10e   : > { %v667_v33 = vrot.slane %v666_v28, 2  ;;  %v769_v49 = vadd.f32 %v768_v48, %v767_v47 }
 0x110   : > { %v668_v50 = vadd.f32 %v667_v33, %v666_v28  ;;  %v770_v16 = vrot.slane %v769_v49, 2 }
 0x112   : > { %v669_v51 = vrot.slane %v668_v50, 1  ;;  %v771_v52 = vadd.f32 %v770_v16, %v769_v49 }
 0x114   : > { %v670_v37 = vadd.f32 %v669_v51, %v668_v50  ;;  %v772_v53 = vrot.slane %v771_v52, 1 }
 0x116   : > { %672 = vst.msk [vmem:[%s255_s15] sm:$0x1] %vm671_vm2, %v670_v37  ;;  %v773_v25 = vadd.f32 %v772_v53, %v771_v52 }
 0x117   : > { %1024 = shalt.err (!%p1021_p3)
}
 0x118   : > { %951 = dma.vmem_to_hbm [thread:$0]  (%p1166_p5), %s800_s16, 16, %s802_s17, %s781_s25   ;;  %774 = vst.msk [vmem:[%s261_s18] sm:$0x1] %vm671_vm2, %v773_v25 }
 0x119   : > { %s785_s14 = scalar_lea.sflag [#allocation5], %s1586_s29  ;;  %s1039_s15 = sshra.s32 %s815_s20, 4  ;;  %s1040_s15 = int_to_ptr.hbm [resolvable:$true] %s1039_s15 }
 0x11a   : > { %s1041_s9 = scalar_lea.hbm %s1040_s15, 1  ;;  %s1045_s10 = scalar_lea.hbm %s1663_s6, 2 }
 0x11b   : > { %p1042_p4 = scmp.ne.s32.totalorder %s1040_s15, %s1041_s9  ;;  %p1046_p9 = scmp.lt.s32.totalorder %s1040_s15, %s1663_s6 }
 0x11c   : > { %p1047_p10 = scmp.lt.s32.totalorder %s1045_s10, %s1041_s9 }
 0x11d   : > { %p1043_p7 = pnand %p1042_p4, %p1166_p5 }
 0x11e   : > { %p1048_p11 = por %p1047_p10, %p1046_p9 }
 0x11f   : > { %p1044_p8 = pneg %p1043_p7 }
 0x121   : > { %p1049_p12 = pnand %p1048_p11, %p1044_p8 }
 0x123   : > { %1052 = shalt.err (!%p1049_p12)
}
 0x124   : > { %952 = dma.vmem_to_hbm [thread:$0]  (%p1166_p5), %s813_s19, 16, %s815_s20, %s785_s14  }
 0x125 PF: > { %p962_p13 = scmp.ge.s32.totalorder %s1091_s24, 2  ;;  %s834_s29 = sand.u32 1, %s1079_s21  }
 0x126   : > { %s835_s16 = scalar_lea.sflag [#allocation3], %s834_s29 }
 0x127   : > { %p956_p0 = pnand %p962_p13, %p1170_p6 }
 0x129   : > { %p957_p1 = pneg %p956_p0 }
 0x12b   : > { %1070 = dma.done.wait (%p957_p1), %s835_s16, 16  }
 0x12c   : > { %1072 = vsyncadd (%p957_p1), %s835_s16, 4294967280  ;;  %s844_s17 = scalar_lea.sflag [#allocation5], %s834_s29 }
 0x12d   : > { %1074 = dma.done.wait (%p957_p1), %s844_s17, 16  }
 0x12e   : > { %1076 = vsyncadd (%p957_p1), %s844_s17, 4294967280  ;;  %p20_p5 = scmp.ge.s32.totalorder %s1153_s27, 4   ;;  %s1666_s21 = smov %s1083_s22 }
 0x12f   : > { %s1667_s22 = smov %s1087_s23  ;;  %s1668_s23 = smov %s1164_s30 }
 0x130   : > { %s1669_s24 = smov %s1153_s27  ;;  %22 = sbr.rel (!%p20_p5) target bundleno = 5 (0x5), region = 100 }
 0x135   :  { %849 = vsyncpa [#allocation3], 1 }
 0x136   :  { %851 = vsyncpa [#allocation3 + $0x1], 1 }
 0x137   :  { %852 = vsyncpa [#allocation5], 1 }
 0x138   :  { %854 = vsyncpa [#allocation5 + $0x1], 1 }

</bundles_post_ra>
